<compile_context>
chip_gen: v7x
topology: tpu7x:2x2x1
jax: 0.10.0
libtpu: 0.0.40
codegen_flags: <defaults>
</compile_context>

<pallas_src>
import math
import numpy as np
import jax
import jax.numpy as jnp
from jax.experimental import pallas as pl
from jax.experimental.pallas import tpu as pltpu


# ---------------------------------------------------------------------------
# Hardware-aware knobs
# ---------------------------------------------------------------------------
_VMEM_LIMIT_CACHE = None
_BUFFERED_OK_CACHE = None


def _vmem_limit_bytes():
    """Scoped-VMEM budget: ~85% of physical VMEM (headroom for Mosaic internal
    scratch), capped at 112 MiB.  ~54 MiB on v7x, ~108 MiB on v5e/v6e."""
    global _VMEM_LIMIT_CACHE
    if _VMEM_LIMIT_CACHE is None:
        cap = 64 * 1024 * 1024
        try:
            info = pltpu.get_tpu_info()
            for attr in ("vmem_capacity_bytes", "vmem_bytes", "vmem_size_bytes"):
                val = getattr(info, attr, None)
                if val:
                    cap = int(val)
                    break
        except Exception:
            pass
        _VMEM_LIMIT_CACHE = min(int(cap * 0.85), 112 * 1024 * 1024)
    return _VMEM_LIMIT_CACHE


def _buffered_ok():
    """Probe once whether pipeline_mode=pl.Buffered(1) is accepted; if not,
    fall back to default double-buffered specs."""
    global _BUFFERED_OK_CACHE
    if _BUFFERED_OK_CACHE is None:
        ok = False
        if hasattr(pl, "Buffered"):
            try:
                def _probe(x_ref, o_ref):
                    o_ref[...] = x_ref[...]

                x = jnp.zeros((8, 128), jnp.float32)
                out = pl.pallas_call(
                    _probe,
                    out_shape=jax.ShapeDtypeStruct((8, 128), jnp.float32),
                    grid=(2,),
                    in_specs=[pl.BlockSpec((8, 128), lambda i: (0, 0),
                                           pipeline_mode=pl.Buffered(1))],
                    out_specs=pl.BlockSpec((8, 128), lambda i: (0, 0)),
                )(x)
                jax.block_until_ready(out)
                ok = True
            except Exception:
                ok = False
        _BUFFERED_OK_CACHE = ok
    return _BUFFERED_OK_CACHE


def _resident_spec(block_shape, index_map):
    """BlockSpec for an operand whose block index never changes; the 2nd pipeline
    buffer is pure VMEM waste, so request a single buffer when supported."""
    if _buffered_ok():
        return pl.BlockSpec(block_shape, index_map, pipeline_mode=pl.Buffered(1))
    return pl.BlockSpec(block_shape, index_map)


def _row_block(m):
    """Row tile for the input-projection matmul (pl.cdiv grid masks the tail)."""
    cap = 1024 if _vmem_limit_bytes() >= 96 * 1024 * 1024 else 512
    return m if m <= cap else cap


def _col_block(g, cap=512):
    """Output-column tile (3H axis).  Must be a multiple of 128 or the full G."""
    if g % 128 != 0:
        return g
    for t in range(cap, 0, -128):
        if g % t == 0:
            return t
    return g


def _time_chunk(seq_len):
    """Timesteps per grid step.  Prefer an 8-multiple divisor of S; otherwise
    fall back to the cap and pad+mask (never a whole-sequence VMEM block)."""
    cap = 64 if _vmem_limit_bytes() >= 96 * 1024 * 1024 else 32
    if seq_len <= cap:
        return seq_len
    for t in range(cap, 7, -1):
        if t % 8 == 0 and seq_len % t == 0:
            return t
    return cap


# ---------------------------------------------------------------------------
# Kernel 1: fused input projection  x[B*S, K] @ Wi[K, 3H] + bi
# ---------------------------------------------------------------------------
def _in_proj_kernel(x_ref, w_ref, b_ref, o_ref):
    acc = jnp.dot(x_ref[...].astype(w_ref.dtype), w_ref[...],
                  preferred_element_type=jnp.float32)
    o_ref[...] = (acc + b_ref[...].astype(jnp.float32)).astype(o_ref.dtype)


def input_projection(x_bsf, w_kg, b_1g, *, out_dtype=jnp.float32):
    """x_bsf: [B, S, K] -> [B, S, 3H] in out_dtype (gates packed r|z|n)."""
    B, S, K = x_bsf.shape
    G = w_kg.shape[1]
    M = B * S
    x2d = x_bsf.reshape(M, K)                 # contiguous reshape, no transpose
    tm = _row_block(M)
    tn = _col_block(G)
    n_blocks = G // tn

    if n_blocks == 1:
        # Fully resident weight/bias -> single pipeline buffer.
        w_spec = _resident_spec((K, G), lambda m, n: (0, 0))
        b_spec = _resident_spec((1, G), lambda m, n: (0, 0))
    else:
        # N-tiled weight/bias: never holds the full (K, 3H) matrix in VMEM.
        w_spec = pl.BlockSpec((K, tn), lambda m, n: (0, n))
        b_spec = pl.BlockSpec((1, tn), lambda m, n: (0, n))

    out = pl.pallas_call(
        _in_proj_kernel,
        out_shape=jax.ShapeDtypeStruct((M, G), out_dtype),
        grid_spec=pltpu.PrefetchScalarGridSpec(
            num_scalar_prefetch=0,
            grid=(pl.cdiv(M, tm), n_blocks),
            in_specs=[
                pl.BlockSpec((tm, K), lambda m, n: (m, 0)),   # row tile
                w_spec,
                b_spec,
            ],
            out_specs=pl.BlockSpec((tm, tn), lambda m, n: (m, n)),
        ),
        compiler_params=pltpu.CompilerParams(
            dimension_semantics=("parallel", "parallel"),
            vmem_limit_bytes=_vmem_limit_bytes()),
    )(x2d, w_kg, b_1g)
    return out.reshape(B, S, G)


# ---------------------------------------------------------------------------
# Kernel 2: recurrent scan (one fused hidden matmul per timestep)
# ---------------------------------------------------------------------------
def _make_scan_kernel(seq_len, t_chunk, needs_mask):
    def kernel(xp_ref, h0_ref, wh_ref, bhn_ref, y_ref, hlast_ref, h_scr):
        c = pl.program_id(1)                      # time-chunk index (sequential)

        @pl.when(c == 0)
        def _():
            h_scr[...] = h0_ref[...].astype(jnp.float32)

        h = h_scr[...]                            # (TB, H) f32 running state
        wh = wh_ref[...]                          # (H, 3H) resident (f32 or bf16)
        hdim = h.shape[-1]
        # Hoisted once per chunk (JAX does not CSE broadcast_in_dim).
        bhn_b = jnp.broadcast_to(bhn_ref[...].astype(jnp.float32), h.shape)

        n_steps = xp_ref.shape[1]
        group = []                                # pending h's for a slab store
        for tt in range(n_steps):                 # statically unrolled
            xp = xp_ref[:, tt, :].astype(jnp.float32)          # (TB, 3H)
            hp = jnp.dot(h.astype(wh.dtype), wh,
                         preferred_element_type=jnp.float32)   # (TB, 3H) MXU
            r = jax.nn.sigmoid(xp[:, :hdim] + hp[:, :hdim])
            z = jax.nn.sigmoid(xp[:, hdim:2 * hdim] + hp[:, hdim:2 * hdim])
            n = jnp.tanh(xp[:, 2 * hdim:] + r * (hp[:, 2 * hdim:] + bhn_b))
            h_new = n + z * (h - n)               # == z*h + (1-z)*n
            if needs_mask:                        # padded tail steps freeze h
                h_new = jnp.where(c * t_chunk + tt < seq_len, h_new, h)
            h = h_new
            group.append(h)
            # dropout == identity (eval mode)
            if len(group) == 8 or tt == n_steps - 1:
                s0 = tt + 1 - len(group)          # sublane-aligned slab store
                y_ref[:, s0:tt + 1, :] = jnp.stack(group, axis=1).astype(y_ref.dtype)
                group = []

        h_scr[...] = h
        hlast_ref[...] = h.astype(hlast_ref.dtype)   # resident out, flushed per b
    return kernel


def gru_scan(x_proj, h0, w_h, b_hn, *, time_chunk=None, batch_blocks=1,
             out_dtype=jnp.float32):
    """x_proj: [B, S, 3H] precomputed input projections; h0: [B, H]."""
    B, S, G = x_proj.shape
    H = w_h.shape[0]
    assert G == 3 * H

    T = _time_chunk(S) if time_chunk is None else time_chunk
    S_pad = -(-S // T) * T
    needs_mask = S_pad != S
    if needs_mask:
        x_proj = jnp.pad(x_proj, ((0, 0), (0, S_pad - S), (0, 0)))
    assert T % 8 == 0 or T == S_pad

    # batch_blocks > 1 only pays on multi-TensorCore parts (v7x); each block must
    # keep >= 8 sublane-aligned rows or it just hurts MXU row occupancy.
    TB = B
    if batch_blocks > 1 and B % batch_blocks == 0:
        tb = B // batch_blocks
        if tb >= 8 and tb % 8 == 0:
            TB = tb

    grid = (B // TB, S_pad // T)
    kernel = _make_scan_kernel(S, T, needs_mask)

    y, h_last = pl.pallas_call(
        kernel,
        out_shape=(
            jax.ShapeDtypeStruct((B, S_pad, H), out_dtype),
            jax.ShapeDtypeStruct((B, H), jnp.float32),
        ),
        grid_spec=pltpu.PrefetchScalarGridSpec(
            num_scalar_prefetch=0,
            grid=grid,
            in_specs=[
                pl.BlockSpec((TB, T, G), lambda b, c: (b, c, 0)),   # x-proj chunk
                pl.BlockSpec((TB, H), lambda b, c: (b, 0)),         # h0 (tiny)
                _resident_spec((H, G), lambda b, c: (0, 0)),        # fused Wh
                _resident_spec((1, H), lambda b, c: (0, 0)),        # b_hn
            ],
            out_specs=[
                pl.BlockSpec((TB, T, H), lambda b, c: (b, c, 0)),   # y slab per chunk
                pl.BlockSpec((TB, H), lambda b, c: (b, 0)),         # h_last
            ],
            scratch_shapes=[pltpu.VMEM((TB, H), jnp.float32)],
        ),
        compiler_params=pltpu.CompilerParams(
            dimension_semantics=("parallel", "arbitrary"),
            vmem_limit_bytes=_vmem_limit_bytes()),
    )(x_proj, h0, w_h, b_hn)

    if needs_mask:
        y = y[:, :S, :]
    return y, h_last


# ---------------------------------------------------------------------------
# Parameters (PyTorch nn.Linear init), packed into fused gate matrices
# ---------------------------------------------------------------------------
def init_gru_params(key, input_size, hidden_size, num_layers,
                    weight_dtype=jnp.float32):
    """Per-gate U(-1/sqrt(fan_in), 1/sqrt(fan_in)) init, then fusion:
       Wi = [Wir|Wiz|Win] (K,3H), Wh = [Whr|Whz|Whn] (H,3H),
       bi = [bir+bhr | biz+bhz | bin] (1,3H);  b_hn kept separate because it
       sits inside the r-gated term r*(h@Whn + b_hn)."""
    layers = []
    for l in range(num_layers):
        in_size = input_size if l == 0 else hidden_size

        def sample(k_, fan_in):
            kw, kb = jax.random.split(k_)
            bound = 1.0 / math.sqrt(fan_in)
            w = jax.random.uniform(kw, (hidden_size, fan_in), jnp.float32,
                                   -bound, bound)
            b = jax.random.uniform(kb, (hidden_size,), jnp.float32,
                                   -bound, bound)
            return jnp.transpose(w), b            # store [in, out]

        key, *ks = jax.random.split(key, 7)
        Wir, bir = sample(ks[0], in_size)
        Whr, bhr = sample(ks[1], hidden_size)
        Wiz, biz = sample(ks[2], in_size)
        Whz, bhz = sample(ks[3], hidden_size)
        Win, bin_ = sample(ks[4], in_size)
        Whn, bhn = sample(ks[5], hidden_size)

        Wi = jnp.concatenate([Wir, Wiz, Win], axis=1).astype(weight_dtype)
        Wh = jnp.concatenate([Whr, Whz, Whn], axis=1).astype(weight_dtype)
        bi = jnp.concatenate([bir + bhr, biz + bhz, bin_], axis=0)
        layers.append({
            "Wi": Wi,
            "Wh": Wh,
            "bi": bi.reshape(1, 3 * hidden_size).astype(jnp.float32),
            "bhn": bhn.reshape(1, hidden_size).astype(jnp.float32),
        })
    return layers


def gru_forward(x_bsf, layer_params, h0=None, *, time_chunk=None, batch_blocks=1,
                intermediate_dtype=jnp.float32):
    """x_bsf: [B, S, I] (PyTorch layout). Returns (y [B,S,H], h_n [B,L,H]).
    intermediate_dtype controls the inter-kernel x_proj / inter-layer y dtype."""
    B, S, _ = x_bsf.shape
    L = len(layer_params)
    H = layer_params[0]["Wh"].shape[0]
    if h0 is None:
        h0 = jnp.zeros((B, L, H), jnp.float32)
    cur = x_bsf
    h_fin = []
    for l, p in enumerate(layer_params):
        last = (l == L - 1)
        x_proj = input_projection(cur, p["Wi"], p["bi"],
                                  out_dtype=intermediate_dtype)     # [B, S, 3H]
        cur, h_last = gru_scan(x_proj, h0[:, l, :], p["Wh"], p["bhn"],
                               time_chunk=time_chunk, batch_blocks=batch_blocks,
                               out_dtype=jnp.float32 if last else intermediate_dtype)
        h_fin.append(h_last)
    return cur, jnp.stack(h_fin, axis=1)


# ---------------------------------------------------------------------------
# Pure-JAX reference (eval-mode dropout) with the same precision policy.
# ---------------------------------------------------------------------------
def gru_reference(x_bsf, layer_params, h0=None, *, intermediate_dtype=jnp.float32):
    B, S, _ = x_bsf.shape
    L = len(layer_params)
    H = layer_params[0]["Wh"].shape[0]
    if h0 is None:
        h0 = jnp.zeros((B, L, H), jnp.float32)
    cur = x_bsf.astype(jnp.float32)
    h_fin = []
    for l, p in enumerate(layer_params):
        wd = p["Wi"].dtype
        bi = p["bi"].astype(jnp.float32)
        bhn = p["bhn"].astype(jnp.float32)
        h = h0[:, l, :].astype(jnp.float32)
        xp_all = jnp.dot(cur.astype(wd), p["Wi"],
                         preferred_element_type=jnp.float32) + bi
        xp_all = xp_all.astype(intermediate_dtype).astype(jnp.float32)
        ys = []
        for t in range(S):
            xp = xp_all[:, t, :]
            hp = jnp.dot(h.astype(wd), p["Wh"],
                         preferred_element_type=jnp.float32)
            r = jax.nn.sigmoid(xp[:, :H] + hp[:, :H])
            z = jax.nn.sigmoid(xp[:, H:2 * H] + hp[:, H:2 * H])
            n = jnp.tanh(xp[:, 2 * H:] + r * (hp[:, 2 * H:] + bhn))
            h = z * h + (1.0 - z) * n
            ys.append(h)
        y = jnp.stack(ys, axis=1)
        if l < L - 1:
            y = y.astype(intermediate_dtype).astype(jnp.float32)
        cur = y
        h_fin.append(h)
    return cur, jnp.stack(h_fin, axis=1)


if __name__ == "__main__":
    batch, seq_len = 2, 8
    input_size, hidden_size, num_layers = 4, 32, 2
    # dropout = 0.0 -> eval-mode identity

    key = jax.random.PRNGKey(0)
    key, kx = jax.random.split(key)
    x = jax.random.normal(kx, (batch, seq_len, input_size), jnp.float32)

    # --- float32 weights & intermediates: tight check vs pure-JAX reference ---
    params_f32 = init_gru_params(key, input_size, hidden_size, num_layers,
                                 weight_dtype=jnp.float32)
    y, h_n = gru_forward(x, params_f32)
    y, h_n = jax.block_until_ready(y), jax.block_until_ready(h_n)
    y_ref, h_ref = gru_reference(x, params_f32)
    assert y.shape == (batch, seq_len, hidden_size)
    assert h_n.shape == (batch, num_layers, hidden_size)
    np.testing.assert_allclose(np.asarray(y), np.asarray(y_ref),
                               rtol=1e-5, atol=1e-5)
    np.testing.assert_allclose(np.asarray(h_n), np.asarray(h_ref),
                               rtol=1e-5, atol=1e-5)

    # --- bf16 weights + bf16 inter-kernel intermediates (halves weight VMEM and
    #     the x_proj / inter-layer y HBM traffic; gate math stays f32) ---
    params_bf16 = init_gru_params(key, input_size, hidden_size, num_layers,
                                  weight_dtype=jnp.bfloat16)
    y16, h16 = gru_forward(x, params_bf16, intermediate_dtype=jnp.bfloat16)
    y16, h16 = jax.block_until_ready(y16), jax.block_until_ready(h16)
    y16_ref, h16_ref = gru_reference(x, params_bf16,
                                     intermediate_dtype=jnp.bfloat16)
    np.testing.assert_allclose(np.asarray(y16), np.asarray(y16_ref),
                               rtol=2e-2, atol=2e-2)
    np.testing.assert_allclose(np.asarray(h16), np.asarray(h16_ref),
                               rtol=2e-2, atol=2e-2)

    print("KERNEL_OK")
</pallas_src>

<mosaic_0001>
module attributes {stable_mosaic.version = 11 : i64} {
  func.func @_probe(%arg0: i32, %arg1: memref<8x128xf32, #tpu.memory_space<vmem>>, %arg2: memref<8x128xf32, #tpu.memory_space<vmem>>) attributes {dimension_semantics = [#tpu.dimension_semantics<arbitrary>], iteration_bounds = array<i64: 2>, scalar_prefetch = 0 : i64, scratch_operands = 0 : i64, tpu.core_type = #tpu.core_type<tc>, window_params = [{pipeline_mode = #tpu.pipeline_mode<synchronous>, transform_indices = @transform_0, window_bounds = array<i64: 8, 128>}, {pipeline_mode = #tpu.pipeline_mode<synchronous>, transform_indices = @transform_1, window_bounds = array<i64: 8, 128>}]} {
    %c0 = arith.constant 0 : index
    %c0_0 = arith.constant 0 : index
    %0 = vector.load %arg1[%c0, %c0_0] : memref<8x128xf32, #tpu.memory_space<vmem>>, vector<8x128xf32>
    %c0_1 = arith.constant 0 : index
    %c0_2 = arith.constant 0 : index
    %1 = vector.load %arg2[%c0_1, %c0_2] : memref<8x128xf32, #tpu.memory_space<vmem>>, vector<8x128xf32>
    tpu.vector_store %arg2[%c0_1, %c0_2], %0 {strides = array<i32>} : memref<8x128xf32, #tpu.memory_space<vmem>>, vector<8x128xf32>,
    return
  }
  func.func @transform_0(%arg0: i32) -> (i32, i32) {
    %c0_i32 = arith.constant 0 : i32
    %c0_i32_0 = arith.constant 0 : i32
    %c0_i32_1 = arith.constant 0 : i32
    return %c0_i32, %c0_i32_0 : i32, i32
  }
  func.func @transform_1(%arg0: i32) -> (i32, i32) {
    %c0_i32 = arith.constant 0 : i32
    %c0_i32_0 = arith.constant 0 : i32
    %c0_i32_1 = arith.constant 0 : i32
    return %c0_i32, %c0_i32_0 : i32, i32
  }
}

module attributes {stable_mosaic.version = 11 : i64} {
  func.func @_in_proj_kernel(%arg0: i32, %arg1: i32, %arg2: memref<16x4xf32, #tpu.memory_space<vmem>>, %arg3: memref<4x96xf32, #tpu.memory_space<vmem>>, %arg4: memref<1x96xf32, #tpu.memory_space<vmem>>, %arg5: memref<16x96xf32, #tpu.memory_space<vmem>>) attributes {dimension_semantics = [#tpu.dimension_semantics<parallel>, #tpu.dimension_semantics<parallel>], iteration_bounds = array<i64: 1, 1>, scalar_prefetch = 0 : i64, scratch_operands = 0 : i64, tpu.core_type = #tpu.core_type<tc>, window_params = [{transform_indices = @transform_0, window_bounds = array<i64: 16, 4>}, {pipeline_mode = #tpu.pipeline_mode<synchronous>, transform_indices = @transform_1, window_bounds = array<i64: 4, 96>}, {pipeline_mode = #tpu.pipeline_mode<synchronous>, transform_indices = @transform_2, window_bounds = array<i64: 1, 96>}, {transform_indices = @transform_3, window_bounds = array<i64: 16, 96>}]} {
    %c0 = arith.constant 0 : index
    %c0_0 = arith.constant 0 : index
    %0 = vector.load %arg2[%c0, %c0_0] : memref<16x4xf32, #tpu.memory_space<vmem>>, vector<16x4xf32>
    %c0_1 = arith.constant 0 : index
    %c0_2 = arith.constant 0 : index
    %1 = vector.load %arg3[%c0_1, %c0_2] : memref<4x96xf32, #tpu.memory_space<vmem>>, vector<4x96xf32>
    %cst = arith.constant dense<0.000000e+00> : vector<16x96xf32>
    %2 = tpu.matmul %0, %1, %cst {dimension_numbers = #tpu.dot_dimension_numbers<[1], [0], [0], [1], [0, 0, 1, 1], [], []>} : vector<16x4xf32>, vector<4x96xf32>, vector<16x96xf32> -> vector<16x96xf32>
    %c0_3 = arith.constant 0 : index
    %c0_4 = arith.constant 0 : index
    %3 = vector.load %arg4[%c0_3, %c0_4] : memref<1x96xf32, #tpu.memory_space<vmem>>, vector<1x96xf32>
    %4 = vector.broadcast %3 : vector<1x96xf32> to vector<16x96xf32>
    %5 = arith.addf %2, %4 : vector<16x96xf32>
    %c0_5 = arith.constant 0 : index
    %c0_6 = arith.constant 0 : index
    %6 = vector.load %arg5[%c0_5, %c0_6] : memref<16x96xf32, #tpu.memory_space<vmem>>, vector<16x96xf32>
    tpu.vector_store %arg5[%c0_5, %c0_6], %5 {strides = array<i32>} : memref<16x96xf32, #tpu.memory_space<vmem>>, vector<16x96xf32>,
    return
  }
  func.func @transform_0(%arg0: i32, %arg1: i32) -> (i32, i32) {
    %c0_i32 = arith.constant 0 : i32
    %c0_i32_0 = arith.constant 0 : i32
    return %arg0, %c0_i32 : i32, i32
  }
  func.func @transform_1(%arg0: i32, %arg1: i32) -> (i32, i32) {
    %c0_i32 = arith.constant 0 : i32
    %c0_i32_0 = arith.constant 0 : i32
    %c0_i32_1 = arith.constant 0 : i32
    return %c0_i32, %c0_i32_0 : i32, i32
  }
  func.func @transform_2(%arg0: i32, %arg1: i32) -> (i32, i32) {
    %c0_i32 = arith.constant 0 : i32
    %c0_i32_0 = arith.constant 0 : i32
    %c0_i32_1 = arith.constant 0 : i32
    return %c0_i32, %c0_i32_0 : i32, i32
  }
  func.func @transform_3(%arg0: i32, %arg1: i32) -> (i32, i32) {
    %c0_i32 = arith.constant 0 : i32
    return %arg0, %arg1 : i32, i32
  }
}

</mosaic_0001>

<bundles_post_ra>
// kernel: tpu_custom_call.1
= control target key start
LH: loop header
LB: loop body
LE: loop exit
PB: predicated region body
PF: predicated region fallthrough
CT: control target
= control target key end

     0   :  { %6 = vsyncpa [#allocation3], 0  ;;  %s340_s0 = inlined_call_operand.hbm [shape: f32[8,128], index: 0, kind: input, shape index: {}]   ;;  %s341_s1 = inlined_call_operand.hbm [shape: f32[8,128], index: 1, kind: output, shape index: {}]  }
   0x1   :  { %7 = vsyncpa [#allocation4], 0  ;;  %s261_s6 = smov 0  }
   0x2 LB: > { %s144_s7 = sadd.s32 4294967295, %s247_s6   ;;  %p145_p0 = scmp.ge.s32.totalorder %s247_s6, 1  ;;  %s247_s6 = sphi %s261_s6, %s13_s6  }
   0x3   : > { %p60_p1 = scmp.lt.s32.totalorder %s247_s6, 3  ;;  %p275_p3 = scmp.eq.s32.totalorder %s144_s7, 0 }
   0x4   : > { %s249_s10 = smov [#allocation2]   ;;  %s179_s15 = scalar_lea.hbm %s340_s0, 128 }
   0x5   : > { %p269_p2 = pnand %p145_p0, %p60_p1  ;;  %s73_s11 = sshll.u32 %s249_s10, 4  ;;  %s74_s11 = int_to_ptr.vmem [resolvable:$true] %s73_s11 }
   0x6   : > { %s346_s9 = scalar_select %p275_p3, 1, 0 }
   0x7   : > { %s345_s8 = scalar_select %p269_p2, 1, 0 }
   0x8   : > { %p161_p4 = pneg %p269_p2  ;;  %p180_p6 = scmp.ne.s32.totalorder %s340_s0, %s179_s15 }
   0x9   : > { %p186_p10 = scmp.lt.u32.totalorder %s179_s15, %s340_s0 }
   0xa   : > { %p283_p5 = pnand %p275_p3, %p161_p4 }
   0xc   : > { %p181_p7 = pneg %p283_p5 }
   0xe   : > { %p182_p8 = pnand %p181_p7, %p180_p6 }
  0x10   : > { %p183_p9 = pneg %p182_p8 }
  0x12   : > { %p188_p11 = pnand %p186_p10, %p183_p9 }
  0x14   : > { %191 = shalt.err (!%p188_p11)
}
  0x15   : > { %s192_s20 = scalar_lea.vmem %s74_s11, 128  ;;  %p200_p1 = scmp.lt.s32.totalorder %s74_s11, %s74_s11 }
  0x16   : > { %p193_p12 = scmp.ne.s32.totalorder %s74_s11, %s192_s20  ;;  %p201_p4 = scmp.lt.s32.totalorder %s192_s20, %s192_s20 }
  0x18   : > { %p195_p13 = pnand %p193_p12, %p181_p7  ;;  %p202_p3 = por %p201_p4, %p200_p1 }
  0x1a   : > { %p196_p0 = pneg %p195_p13 }
  0x1c   : > { %p203_p2 = pnand %p202_p3, %p196_p0 }
  0x1e   : > { %206 = shalt.err (!%p203_p2)
}
  0x1f   : > { %164 = dma.hbm_to_vmem [thread:$0]  (!%p283_p5), %s340_s0, 128, %s74_s11, [#allocation3]  }
  0x20   : > { %p348_p6 = scmp.ne.s32.totalorder %s345_s8, 0 }
  0x21   : > { %p349_p8 = scmp.ne.s32.totalorder (!%p348_p6), %s346_s9, 0 }
  0x22   : > { %86 = sbr.rel (%p348_p6) target bundleno = 67 (0x43), region = 24 }
  0x29   : > { %238 = dma.done.wait (%p349_p8), [#allocation3], 128  }
  0x2a   : > { %240 = vsyncadd (%p349_p8), [#allocation3], 4294967168  ;;  %s250_s23 = smov [#allocation5]   ;;  %p311_p2 = scmp.eq.s32.totalorder %s144_s7, 1  ;;  %v96_v0 = vld [vmem:[#allocation2] sm:$0xff] }
  0x2b   : > { %s105_s24 = sshll.u32 %s250_s23, 4  ;;  %97 = vst [vmem:[#allocation5] sm:$0xff] %v96_v0  ;;  %s106_s24 = int_to_ptr.vmem [resolvable:$true] %s105_s24 }
  0x2c   : > { %s207_s26 = scalar_lea.vmem %s106_s24, 128  ;;  %p214_p9 = scmp.lt.s32.totalorder %s106_s24, %s106_s24 }
  0x2d   : > { %p208_p3 = scmp.ne.s32.totalorder %s106_s24, %s207_s26  ;;  %p215_p10 = scmp.lt.s32.totalorder %s207_s26, %s207_s26 }
  0x2f   : > { %p209_p5 = pnand %p208_p3, %p311_p2  ;;  %p216_p11 = por %p215_p10, %p214_p9 }
  0x31   : > { %p210_p7 = pneg %p209_p5 }
  0x33   : > { %p217_p12 = pnand %p216_p11, %p210_p7 }
  0x35   : > { %220 = shalt.err (!%p217_p12)
}
  0x36   : > { %s221_s29 = scalar_lea.hbm %s341_s1, 128 }
  0x37   : > { %p222_p13 = scmp.ne.s32.totalorder %s341_s1, %s221_s29  ;;  %p227_p4 = scmp.lt.u32.totalorder %s221_s29, %s341_s1 }
  0x39   : > { %p223_p0 = pnand %p222_p13, %p311_p2 }
  0x3b   : > { %p224_p1 = pneg %p223_p0 }
  0x3d   : > { %p229_p6 = pnand %p227_p4, %p224_p1 }
  0x3f   : > { %232 = shalt.err (!%p229_p6)
}
  0x40   : > { %158 = dma.vmem_to_hbm [thread:$0]  (%p311_p2), %s106_s24, 128, %s341_s1, [#allocation4]  }
  0x41   : > { %242 = dma.done.wait (%p311_p2), [#allocation4], 128  }
  0x42   : > { %244 = vsyncadd (%p311_p2), [#allocation4], 4294967168 }
  0x43 PF: > { %s13_s6 = sadd.s32 1, %s247_s6  }
  0x44   : > { %p10_p8 = scmp.ge.s32.totalorder %s13_s6, 4  }
  0x46   :  { %12 = sbr.rel (!%p10_p8) target bundleno = 2 (0x2), region = 53 }
  0x4d   :  { %118 = vsyncpa [#allocation3], 1 }
  0x4e   :  { %120 = vsyncpa [#allocation3 + $0x1], 1 }
  0x4f   :  { %121 = vsyncpa [#allocation4], 1 }
  0x50   :  { %123 = vsyncpa [#allocation4 + $0x1], 1 }

// kernel: tpu_custom_call.1
= control target key start
LH: loop header
LB: loop body
LE: loop exit
PB: predicated region body
PF: predicated region fallthrough
CT: control target
= control target key end

     0   :  { %vm32_vm0 = vcmask 1043456   ;;  %vm25_vm1 = vcmask 31744   ;;  %s216_s0 = inlined_call_operand.vmem [shape: f32[16,4], index: 0, kind: input, shape index: {}]   ;;  %s217_s1 = inlined_call_operand.vmem [shape: f32[4,96], index: 1, kind: input, shape index: {}]   ;;  %s218_s2 = inlined_call_operand.vmem [shape: f32[1,96], index: 2, kind: input, shape index: {}]   ;;  %s219_s3 = inlined_call_operand.hbm [shape: f32[16,96], index: 3, kind: output, shape index: {}]  }
   0x1   :  { %v17_v0 = vld [vmem:[%s217_s1] sm:$0xf]  ;;  %v16_v2 = vld [vmem:[%s216_s0 + $0x8] sm:$0xff] }
   0x2   :  { %v15_v1 = vld [vmem:[%s216_s0] sm:$0xff]  ;;  %137 = vmatprep.subr.msk.mxu0 %vm32_vm0, %v17_v0 }
   0x3   :  { %139 = vmatprep.mubr.msk.f32.mxu0 %vm25_vm1, %v15_v1 }
   0x4   :  { %8 = vsyncpa [#allocation3], 0  ;;  %138 = vmatpush3.msk.msra.mxu0 %vm32_vm0, %v17_v0  ;;  %v130_v3 = vld [vmem:[%s218_s2] ss:$0 sm:$0xff]  ;;  %s169_s1 = smov [#allocation2]   ;;  %vm111_vm2 = vcmask 785408  }
   0x5   :  { %140 = vmatmul.mubr.msk.f32.vlgmr.msra.gmra.mrb[0].mxu0 %vm25_vm1, %v16_v2  ;;  %s119_s20 = sshll.u32 %s169_s1, 4  ;;  %s120_s20 = int_to_ptr.vmem [resolvable:$true] %s119_s20 }
   0x6   :  { %s145_s0 = scalar_lea.vmem %s120_s20, 256  ;;  %p150_p1 = scmp.lt.s32.totalorder %s120_s20, %s120_s20 }
   0x7   :  { %p146_p0 = scmp.ne.s32.totalorder %s120_s20, %s145_s0  ;;  %p151_p2 = scmp.lt.s32.totalorder %s145_s0, %s145_s0 }
   0x9   :  { %p152_p3 = por %p151_p2, %p150_p1 }
   0xb   :  { %p153_p4 = pnand %p152_p3, %p146_p0 }
  0xd8   :  { %v141_v4 = vpop.f32.mrb[0].mxu0 }
  0xd9   :  { %v108_v5 = vadd.f32 %v141_v4, %v130_v3  ;;  %v102_v6 = vpop.f32.mrb[1].mxu0 }
  0xda   :  { %v103_v7 = vadd.f32 %v130_v3, %v102_v6 }
  0xdb   :  { %113 = vst.msk [vmem:[#allocation2 + $0x8] sm:$0xff] %vm111_vm2, %v108_v5 }
  0xdc   :  { %112 = vst.msk [vmem:[#allocation2] sm:$0xff] %vm111_vm2, %v103_v7 }
  0xdd   :  { %156 = shalt.err (!%p153_p4)
}
  0xde   :  { %s157_s2 = scalar_lea.hbm %s219_s3, 256 }
  0xdf   :  { %p158_p5 = scmp.ne.s32.totalorder %s219_s3, %s157_s2  ;;  %p161_p6 = scmp.lt.u32.totalorder %s157_s2, %s219_s3 }
  0xe1   :  { %p163_p7 = pnand %p161_p6, %p158_p5 }
  0xe3   :  { %166 = shalt.err (!%p163_p7)
}
  0xe4   :  { %s170_s27 = smov 128   ;;  %s171_s28 = smov 8  }
  0xe5   :  { %125 = dma.vmem_to_hbm [thread:$0]  %s120_s20, 256, %s219_s3, [#allocation3], %s170_s27, %s170_s27, %s171_s28  }
  0xe6   :  { %167 = dma.done.wait [#allocation3], 256  }
  0xe7   :  { %168 = vsyncadd [#allocation3], 4294967040 }
  0xe8   :  { %129 = vsyncpa [#allocation3], 1 }

</bundles_post_ra>
